<compile_context>
chip_gen: v6e
topology: v6e:2x2x1
jax: 0.10.0
libtpu: 0.0.40
codegen_flags: <defaults>
</compile_context>

<pallas_src>
import functools

import jax
import jax.numpy as jnp
from jax.experimental import pallas as pl
from jax.experimental.pallas import tpu as pltpu

IN_DIM = 784       # 1*28*28
HID_DIM = 512
LATENT_DIMS = 32   # latent_dims
BATCH = 2


def _round_up(n, m):
    return ((n + m - 1) // m) * m


def _vae_encoder_kernel(n_valid, tile_m,
                        x_ref, w1_ref, b1_ref, w23_ref, b23_ref, eps_ref,
                        z_ref, kl_ref):
    """One batch tile: x (tile_m, 784) bf16; weights VMEM-resident."""
    i = pl.program_id(0)

    @pl.when(i == 0)
    def _():
        kl_ref[0, 0] = 0.0

    # h = relu(x @ W1 + b1): bf16 inputs, f32 accumulation on the MXU.
    x = x_ref[...]
    h = jnp.dot(x, w1_ref[...], preferred_element_type=jnp.float32) + b1_ref[...]
    h = jnp.maximum(h, 0.0)

    # Fused projection: [mu | log_sigma] = h @ W23 + b23  -> (tile_m, 64)
    h23 = jnp.dot(h.astype(w23_ref.dtype), w23_ref[...],
                  preferred_element_type=jnp.float32) + b23_ref[...]
    mu = h23[:, :LATENT_DIMS]
    log_sigma = h23[:, LATENT_DIMS:]
    sigma = jnp.exp(log_sigma)          # EUP

    # Reparameterization: z = mu + sigma * eps
    z_ref[...] = (mu + sigma * eps_ref[...]).astype(z_ref.dtype)

    # KL = sum(sigma^2 + mu^2 - log(sigma) - 1/2); log(sigma) == log_sigma.
    # Mask out padded batch rows, accumulate the scalar into SMEM.
    row = jax.lax.broadcasted_iota(jnp.int32, (tile_m, 1), 0) + i * tile_m
    valid = row < n_valid
    kl_elem = sigma * sigma + mu * mu - log_sigma - 0.5
    kl_ref[0, 0] += jnp.sum(jnp.where(valid, kl_elem, 0.0))


def variational_encoder_forward(x_nchw, packed_params, eps, *, tile_m=256):
    """x_nchw: (B, 1, 28, 28) f32.  Returns (z (B, LATENT_DIMS) f32, kl scalar f32)."""
    B = x_nchw.shape[0]
    x_flat = x_nchw.reshape(B, -1).astype(jnp.bfloat16)   # torch.flatten(x, 1)

    w1, b1, w23, b23 = packed_params
    w1 = w1.astype(jnp.bfloat16)
    w23 = w23.astype(jnp.bfloat16)

    # Batch tiling (padded); for toy batches this collapses to a single tile.
    tm = min(tile_m, _round_up(B, 16))
    b_pad = _round_up(B, tm)
    if b_pad != B:
        x_flat = jnp.pad(x_flat, ((0, b_pad - B), (0, 0)))
        eps_p = jnp.pad(eps, ((0, b_pad - B), (0, 0)))
    else:
        eps_p = eps

    kernel = functools.partial(_vae_encoder_kernel, B, tm)

    z, kl = pl.pallas_call(
        kernel,
        out_shape=(
            jax.ShapeDtypeStruct((b_pad, LATENT_DIMS), jnp.float32),
            jax.ShapeDtypeStruct((1, 1), jnp.float32),
        ),
        grid_spec=pltpu.PrefetchScalarGridSpec(
            num_scalar_prefetch=0,
            grid=(b_pad // tm,),
            in_specs=[
                pl.BlockSpec((tm, IN_DIM), lambda i: (i, 0)),              # x tile
                pl.BlockSpec((IN_DIM, HID_DIM), lambda i: (0, 0)),         # W1 (pinned)
                pl.BlockSpec((1, HID_DIM), lambda i: (0, 0)),              # b1 (pinned)
                pl.BlockSpec((HID_DIM, 2 * LATENT_DIMS), lambda i: (0, 0)),  # W23 (pinned)
                pl.BlockSpec((1, 2 * LATENT_DIMS), lambda i: (0, 0)),        # b23 (pinned)
                pl.BlockSpec((tm, LATENT_DIMS), lambda i: (i, 0)),         # eps tile
            ],
            out_specs=(
                pl.BlockSpec((tm, LATENT_DIMS), lambda i: (i, 0)),         # z tile
                pl.BlockSpec(memory_space=pltpu.MemorySpace.SMEM),         # KL scalar
            ),
        ),
        # KL accumulates across batch tiles -> reduction axis, keep "arbitrary".
        # (On v7x one could split KL into per-tile partials to use "parallel".)
        compiler_params=pltpu.CompilerParams(
            dimension_semantics=("arbitrary",),
        ),
    )(x_flat, w1, b1, w23, b23, eps_p)
    return z[:B], kl[0, 0]


def init_params(key):
    """Deterministic init mimicking nn.Linear default (U[-1/sqrt(fan_in), +])."""
    k1, k2, k3, k4, k5, k6 = jax.random.split(key, 6)

    def lin(kw, kb, fan_in, fan_out):
        bound = 1.0 / jnp.sqrt(fan_in)
        w = jax.random.uniform(kw, (fan_in, fan_out), jnp.float32, -bound, bound)
        b = jax.random.uniform(kb, (1, fan_out), jnp.float32, -bound, bound)
        return w, b

    w1, b1 = lin(k1, k2, IN_DIM, HID_DIM)
    w2, b2 = lin(k3, k4, HID_DIM, LATENT_DIMS)
    w3, b3 = lin(k5, k6, HID_DIM, LATENT_DIMS)
    return (w1, b1, w2, b2, w3, b3)


def pack_params(params):
    """Fuse linear2/linear3 into one (512, 64) projection for the kernel."""
    w1, b1, w2, b2, w3, b3 = params
    w23 = jnp.concatenate([w2, w3], axis=1)
    b23 = jnp.concatenate([b2, b3], axis=1)
    return (w1, b1, w23, b23)


if __name__ == "__main__":
    key = jax.random.PRNGKey(0)
    k_x, k_p, k_eps = jax.random.split(key, 3)

    x = jax.random.normal(k_x, (BATCH, 1, 28, 28), jnp.float32)
    params = init_params(k_p)
    # N(0,1) sample for the reparameterization trick (self.N.sample(mu.shape)).
    # (Could be generated in-kernel via pltpu.prng_seed/stateful_normal; kept
    #  as an input so the result is checkable against a pure-JAX reference.)
    eps = jax.random.normal(k_eps, (BATCH, LATENT_DIMS), jnp.float32)

    z, kl = variational_encoder_forward(x, pack_params(params), eps)
    jax.block_until_ready((z, kl))

    # Pure-JAX f32 reference (kernel uses bf16 inputs -> loosened tolerances).
    w1, b1, w2, b2, w3, b3 = params
    xf = x.reshape(BATCH, -1)
    h = jnp.maximum(xf @ w1 + b1, 0.0)
    mu_r = h @ w2 + b2
    sig_r = jnp.exp(h @ w3 + b3)
    z_r = mu_r + sig_r * eps
    kl_r = jnp.sum(sig_r**2 + mu_r**2 - jnp.log(sig_r) - 0.5)
    assert z.shape == (BATCH, LATENT_DIMS)
    assert jnp.allclose(z, z_r, atol=5e-2, rtol=5e-2), (z, z_r)
    assert jnp.allclose(kl, kl_r, atol=0.5, rtol=5e-2), (kl, kl_r)

    print("KERNEL_OK")
</pallas_src>

<mosaic_0001>
module attributes {stable_mosaic.version = 11 : i64} {
  func.func @_vae_encoder_kernel(%arg0: i32, %arg1: memref<16x784xbf16, #tpu.memory_space<vmem>>, %arg2: memref<784x512xbf16, #tpu.memory_space<vmem>>, %arg3: memref<1x512xf32, #tpu.memory_space<vmem>>, %arg4: memref<512x64xbf16, #tpu.memory_space<vmem>>, %arg5: memref<1x64xf32, #tpu.memory_space<vmem>>, %arg6: memref<16x32xf32, #tpu.memory_space<vmem>>, %arg7: memref<16x32xf32, #tpu.memory_space<vmem>>, %arg8: memref<1x1xf32, #tpu.memory_space<smem>>) attributes {dimension_semantics = [#tpu.dimension_semantics<arbitrary>], iteration_bounds = array<i64: 1>, scalar_prefetch = 0 : i64, scratch_operands = 0 : i64, tpu.core_type = #tpu.core_type<tc>, window_params = [{transform_indices = @transform_0, window_bounds = array<i64: 16, 784>}, {pipeline_mode = #tpu.pipeline_mode<synchronous>, transform_indices = @transform_1, window_bounds = array<i64: 784, 512>}, {pipeline_mode = #tpu.pipeline_mode<synchronous>, transform_indices = @transform_2, window_bounds = array<i64: 1, 512>}, {pipeline_mode = #tpu.pipeline_mode<synchronous>, transform_indices = @transform_3, window_bounds = array<i64: 512, 64>}, {pipeline_mode = #tpu.pipeline_mode<synchronous>, transform_indices = @transform_4, window_bounds = array<i64: 1, 64>}, {transform_indices = @transform_5, window_bounds = array<i64: 16, 32>}, {transform_indices = @transform_6, window_bounds = array<i64: 16, 32>}, {transform_indices = @transform_7, window_bounds = array<i64: 1, 1>}]} {
    %c0_i32 = arith.constant 0 : i32
    %0 = arith.cmpi eq, %arg0, %c0_i32 : i32
    %1 = arith.extui %0 : i1 to i32
    %c0_i32_0 = arith.constant 0 : i32
    %2 = arith.cmpi ne, %1, %c0_i32_0 : i32
    scf.if %2 {
      %cst_23 = arith.constant 0.000000e+00 : f32
      %c0_24 = arith.constant 0 : index
      %c0_25 = arith.constant 0 : index
      %47 = memref.load %arg8[%c0_24, %c0_25] : memref<1x1xf32, #tpu.memory_space<smem>>
      memref.store %cst_23, %arg8[%c0_24, %c0_25] : memref<1x1xf32, #tpu.memory_space<smem>>
    } else {
    }
    %c0 = arith.constant 0 : index
    %c0_1 = arith.constant 0 : index
    %3 = vector.load %arg1[%c0, %c0_1] : memref<16x784xbf16, #tpu.memory_space<vmem>>, vector<16x784xbf16>
    %c0_2 = arith.constant 0 : index
    %c0_3 = arith.constant 0 : index
    %4 = vector.load %arg2[%c0_2, %c0_3] : memref<784x512xbf16, #tpu.memory_space<vmem>>, vector<784x512xbf16>
    %cst = arith.constant dense<0.000000e+00> : vector<16x512xf32>
    %5 = tpu.matmul %3, %4, %cst {dimension_numbers = #tpu.dot_dimension_numbers<[1], [0], [0], [1], [0, 0, 1, 1], [], []>} : vector<16x784xbf16>, vector<784x512xbf16>, vector<16x512xf32> -> vector<16x512xf32>
    %c0_4 = arith.constant 0 : index
    %c0_5 = arith.constant 0 : index
    %6 = vector.load %arg3[%c0_4, %c0_5] : memref<1x512xf32, #tpu.memory_space<vmem>>, vector<1x512xf32>
    %7 = vector.broadcast %6 : vector<1x512xf32> to vector<16x512xf32>
    %8 = arith.addf %5, %7 : vector<16x512xf32>
    %cst_6 = arith.constant 0.000000e+00 : f32
    %9 = vector.broadcast %cst_6 : f32 to vector<16x512xf32>
    %10 = arith.maximumf %8, %9 : vector<16x512xf32>
    %11 = arith.truncf %10 : vector<16x512xf32> to vector<16x512xbf16>
    %c0_7 = arith.constant 0 : index
    %c0_8 = arith.constant 0 : index
    %12 = vector.load %arg4[%c0_7, %c0_8] : memref<512x64xbf16, #tpu.memory_space<vmem>>, vector<512x64xbf16>
    %cst_9 = arith.constant dense<0.000000e+00> : vector<16x64xf32>
    %13 = tpu.matmul %11, %12, %cst_9 {dimension_numbers = #tpu.dot_dimension_numbers<[1], [0], [0], [1], [0, 0, 1, 1], [], []>} : vector<16x512xbf16>, vector<512x64xbf16>, vector<16x64xf32> -> vector<16x64xf32>
    %c0_10 = arith.constant 0 : index
    %c0_11 = arith.constant 0 : index
    %14 = vector.load %arg5[%c0_10, %c0_11] : memref<1x64xf32, #tpu.memory_space<vmem>>, vector<1x64xf32>
    %15 = vector.broadcast %14 : vector<1x64xf32> to vector<16x64xf32>
    %16 = arith.addf %13, %15 : vector<16x64xf32>
    %17 = vector.extract_strided_slice %16 {offsets = [0, 0], sizes = [16, 32], strides = [1, 1]} : vector<16x64xf32> to vector<16x32xf32>
    %18 = vector.extract_strided_slice %16 {offsets = [0, 32], sizes = [16, 32], strides = [1, 1]} : vector<16x64xf32> to vector<16x32xf32>
    %19 = math.exp %18 : vector<16x32xf32>
    %c0_12 = arith.constant 0 : index
    %c0_13 = arith.constant 0 : index
    %20 = vector.load %arg6[%c0_12, %c0_13] : memref<16x32xf32, #tpu.memory_space<vmem>>, vector<16x32xf32>
    %21 = arith.mulf %19, %20 : vector<16x32xf32>
    %22 = arith.addf %17, %21 : vector<16x32xf32>
    %c0_14 = arith.constant 0 : index
    %c0_15 = arith.constant 0 : index
    %23 = vector.load %arg7[%c0_14, %c0_15] : memref<16x32xf32, #tpu.memory_space<vmem>>, vector<16x32xf32>
    tpu.vector_store %arg7[%c0_14, %c0_15], %22 {strides = array<i32>} : memref<16x32xf32, #tpu.memory_space<vmem>>, vector<16x32xf32>,
    %24 = tpu.iota {dimensions = array<i32: 0>} : vector<16x1xi32>
    %c16_i32 = arith.constant 16 : i32
    %25 = arith.muli %arg0, %c16_i32 : i32
    %26 = vector.broadcast %25 : i32 to vector<16x1xi32>
    %27 = arith.addi %24, %26 : vector<16x1xi32>
    %c2_i32 = arith.constant 2 : i32
    %28 = vector.broadcast %c2_i32 : i32 to vector<16x1xi32>
    %29 = arith.cmpi slt, %27, %28 : vector<16x1xi32>
    %30 = arith.mulf %19, %19 : vector<16x32xf32>
    %31 = arith.mulf %17, %17 : vector<16x32xf32>
    %32 = arith.addf %30, %31 : vector<16x32xf32>
    %33 = arith.subf %32, %18 : vector<16x32xf32>
    %cst_16 = arith.constant 5.000000e-01 : f32
    %34 = vector.broadcast %cst_16 : f32 to vector<16x32xf32>
    %35 = arith.subf %33, %34 : vector<16x32xf32>
    %c0_17 = arith.constant 0 : index
    %c0_18 = arith.constant 0 : index
    %36 = memref.load %arg8[%c0_17, %c0_18] : memref<1x1xf32, #tpu.memory_space<smem>>
    %cst_19 = arith.constant 0.000000e+00 : f32
    %37 = vector.shape_cast %29 : vector<16x1xi1> to vector<16x1xi1>
    %38 = vector.broadcast %37 : vector<16x1xi1> to vector<16x32xi1>
    %39 = vector.broadcast %cst_19 : f32 to vector<16x32xf32>
    %40 = arith.select %38, %35, %39 : vector<16x32xi1>, vector<16x32xf32>
    %41 = vector.shape_cast %40 : vector<16x32xf32> to vector<1x16x32xf32>
    %cst_20 = arith.constant dense<0.000000e+00> : vector<1xf32>
    %42 = vector.multi_reduction <add>, %41, %cst_20 [1, 2] : vector<1x16x32xf32> to vector<1xf32>
    %43 = vector.shape_cast %42 : vector<1xf32> to vector<1x1x1xf32>
    %44 = vector.extract %43[0, 0, 0] : f32 from vector<1x1x1xf32>
    %45 = arith.addf %36, %44 : f32
    %c0_21 = arith.constant 0 : index
    %c0_22 = arith.constant 0 : index
    %46 = memref.load %arg8[%c0_21, %c0_22] : memref<1x1xf32, #tpu.memory_space<smem>>
    memref.store %45, %arg8[%c0_21, %c0_22] : memref<1x1xf32, #tpu.memory_space<smem>>
    return
  }
  func.func @transform_0(%arg0: i32) -> (i32, i32) {
    %c0_i32 = arith.constant 0 : i32
    %c0_i32_0 = arith.constant 0 : i32
    return %arg0, %c0_i32 : i32, i32
  }
  func.func @transform_1(%arg0: i32) -> (i32, i32) {
    %c0_i32 = arith.constant 0 : i32
    %c0_i32_0 = arith.constant 0 : i32
    %c0_i32_1 = arith.constant 0 : i32
    return %c0_i32, %c0_i32_0 : i32, i32
  }
  func.func @transform_2(%arg0: i32) -> (i32, i32) {
    %c0_i32 = arith.constant 0 : i32
    %c0_i32_0 = arith.constant 0 : i32
    %c0_i32_1 = arith.constant 0 : i32
    return %c0_i32, %c0_i32_0 : i32, i32
  }
  func.func @transform_3(%arg0: i32) -> (i32, i32) {
    %c0_i32 = arith.constant 0 : i32
    %c0_i32_0 = arith.constant 0 : i32
    %c0_i32_1 = arith.constant 0 : i32
    return %c0_i32, %c0_i32_0 : i32, i32
  }
  func.func @transform_4(%arg0: i32) -> (i32, i32) {
    %c0_i32 = arith.constant 0 : i32
    %c0_i32_0 = arith.constant 0 : i32
    %c0_i32_1 = arith.constant 0 : i32
    return %c0_i32, %c0_i32_0 : i32, i32
  }
  func.func @transform_5(%arg0: i32) -> (i32, i32) {
    %c0_i32 = arith.constant 0 : i32
    %c0_i32_0 = arith.constant 0 : i32
    return %arg0, %c0_i32 : i32, i32
  }
  func.func @transform_6(%arg0: i32) -> (i32, i32) {
    %c0_i32 = arith.constant 0 : i32
    %c0_i32_0 = arith.constant 0 : i32
    return %arg0, %c0_i32 : i32, i32
  }
  func.func @transform_7(%arg0: i32) -> (i32, i32) {
    %c0_i32 = arith.constant 0 : i32
    %c0_i32_0 = arith.constant 0 : i32
    %c0_i32_1 = arith.constant 0 : i32
    return %c0_i32, %c0_i32_0 : i32, i32
  }
}

</mosaic_0001>

<bundles_post_ra>
// kernel: tpu_custom_call.1
= control target key start
LH: loop header
LB: loop body
LE: loop exit
PB: predicated region body
PF: predicated region fallthrough
CT: control target
= control target key end

     0   :  { %13 = vsyncpa [#allocation3], 0  ;;  %s3038_s0 = inlined_call_operand.vmem [shape: bf16[16,784], index: 0, kind: input, shape index: {}]   ;;  %s3039_s1 = inlined_call_operand.hbm [shape: bf16[784,512], index: 1, kind: input, shape index: {}]   ;;  %s3040_s2 = inlined_call_operand.vmem [shape: f32[1,512], index: 2, kind: input, shape index: {}]   ;;  %s3041_s3 = inlined_call_operand.vmem [shape: bf16[512,64], index: 3, kind: input, shape index: {}]   ;;  %s3042_s4 = inlined_call_operand.vmem [shape: f32[1,64], index: 4, kind: input, shape index: {}]   ;;  %s3043_s5 = inlined_call_operand.vmem [shape: f32[16,32], index: 5, kind: input, shape index: {}]   ;;  %s3044_s6 = inlined_call_operand.hbm [shape: f32[16,32], index: 6, kind: output, shape index: {0}]   ;;  %s3045_s7 = inlined_call_operand.hbm [shape: f32[1,1], index: 7, kind: output, shape index: {1}]  }
   0x1   :  { %14 = vsyncpa [#allocation4], 0 }
   0x2   :  { %15 = vsyncpa [#allocation5], 0  ;;  %s2802_s24 = smov [#allocation2]  }
   0x3   :  { %s23_s25 = sshll.u32 %s2802_s24, 4  ;;  %s24_s25 = int_to_ptr.vmem [resolvable:$true] %s23_s25 }
   0x4   :  { %s2756_s26 = scalar_lea.vmem %s24_s25, 25088  ;;  %p2761_p1 = scmp.lt.s32.totalorder %s24_s25, %s24_s25 }
   0x5   :  { %p2757_p0 = scmp.ne.s32.totalorder %s24_s25, %s2756_s26  ;;  %p2762_p2 = scmp.lt.s32.totalorder %s2756_s26, %s2756_s26 }
   0x7   :  { %p2763_p3 = por %p2762_p2, %p2761_p1 }
   0x9   :  { %p2764_p4 = pnand %p2763_p3, %p2757_p0 }
   0xb   :  { %2767 = shalt.err (!%p2764_p4)
}
   0xc   :  { %s2803_s27 = smov 256   ;;  %s2804_s28 = smov 16  }
   0xd   :  { %29 = dma.hbm_to_vmem [thread:$0]  %s3039_s1, 25088, %s24_s25, [#allocation3], %s2803_s27, %s2803_s27, %s2804_s28  }
   0xe   :  { %2796 = dma.done.wait [#allocation3], 25088  }
   0xf   :  { %2797 = vsyncadd [#allocation3], 4294942208  ;;  %v2408_v0 = vld [vmem:[#allocation2 + $0xe4] ss:$16 sps:$4 sm:$0xff]   ;;  %v2412_v2 = vld [vmem:[#allocation2 + $0xe0] ss:$16 sps:$4 sm:$0xff]  }
  0x10   :  { %v2410_v1 = vld [vmem:[#allocation2 + $0x2e4] ss:$16 sps:$4 sm:$0xff]   ;;  %1293 = vmatprep.subr.bf16.mxu0 %v2408_v0  ;;  %v2413_v3 = vld [vmem:[#allocation2 + $0x2e0] ss:$16 sps:$4 sm:$0xff]   ;;  %v2864_v51 = vld [vmem:[%s3038_s0 + $0xc] ss:$28 sps:$4 sm:$0xff]  }
  0x11   :  { %1336 = vmatprep.subr.bf16.mxu1 %v2410_v1  ;;  %v2414_v4 = vld [vmem:[#allocation2 + $0xc4] ss:$16 sps:$4 sm:$0xff]   ;;  %1294 = vmatpush1.bf16.msra.mxu0 %v2412_v2  ;;  %v2418_v6 = vld [vmem:[#allocation2 + $0xc0] ss:$16 sps:$4 sm:$0xff]   ;;  %vm1289_vm0 = vcmask 130048   ;;  %s2807_s12 = smov 96  }
  0x12   :  { %1337 = vmatpush1.bf16.msra.mxu1 %v2413_v3  ;;  %v2416_v5 = vld [vmem:[#allocation2 + $0x2c4] ss:$16 sps:$4 sm:$0xff]   ;;  %1295 = vmatprep.subr.bf16.mxu0 %v2414_v4  ;;  %v2419_v7 = vld [vmem:[#allocation2 + $0x2c0] ss:$16 sps:$4 sm:$0xff]   ;;  %s2808_s13 = smov 32   ;;  %vm2020_vm2 = vcmask 261120  }
  0x13   :  { %1338 = vmatprep.subr.bf16.mxu1 %v2416_v5  ;;  %v2420_v8 = vld [vmem:[#allocation2 + $0xa4] ss:$16 sps:$4 sm:$0xff]   ;;  %v2424_v10 = vld [vmem:[#allocation2 + $0xa0] ss:$16 sps:$4 sm:$0xff]   ;;  %1368 = vmatprep.mubr.bf16.mxu1 %v2864_v51 }
  0x14   :  { %v2422_v9 = vld [vmem:[#allocation2 + $0x2a4] ss:$16 sps:$4 sm:$0xff]   ;;  %v2425_v11 = vld [vmem:[#allocation2 + $0x2a0] ss:$16 sps:$4 sm:$0xff]  }
  0x15   :  { %1296 = vmatpush1.bf16.msra.mxu0 %v2418_v6  ;;  %v2426_v12 = vld [vmem:[#allocation2 + $0x84] ss:$16 sps:$4 sm:$0xff]   ;;  %v2430_v14 = vld [vmem:[#allocation2 + $0x80] ss:$16 sps:$4 sm:$0xff]  }
  0x16   :  { %1339 = vmatpush1.bf16.msra.mxu1 %v2419_v7  ;;  %1297 = vmatprep.subr.bf16.mxu0 %v2420_v8  ;;  %v2428_v13 = vld [vmem:[#allocation2 + $0x284] ss:$16 sps:$4 sm:$0xff]   ;;  %v2431_v15 = vld [vmem:[#allocation2 + $0x280] ss:$16 sps:$4 sm:$0xff]  }
  0x17   :  { %1340 = vmatprep.subr.bf16.mxu1 %v2422_v9  ;;  %v2432_v16 = vld [vmem:[#allocation2 + $0x64] ss:$16 sps:$4 sm:$0xff]   ;;  %v2436_v18 = vld [vmem:[#allocation2 + $0x60] ss:$16 sps:$4 sm:$0xff]   ;;  %v2521_v9 = vld [vmem:[#allocation2 + $0xec] ss:$16 sps:$4 sm:$0xff]  }
  0x18   :  { %v2434_v17 = vld [vmem:[#allocation2 + $0x264] ss:$16 sps:$4 sm:$0xff]   ;;  %v2437_v19 = vld [vmem:[#allocation2 + $0x260] ss:$16 sps:$4 sm:$0xff]  }
  0x19   :  { %1298 = vmatpush1.bf16.msra.mxu0 %v2424_v10  ;;  %v2438_v20 = vld [vmem:[#allocation2 + $0x44] ss:$16 sps:$4 sm:$0xff]   ;;  %v2442_v22 = vld [vmem:[#allocation2 + $0x40] ss:$16 sps:$4 sm:$0xff]  }
  0x1a   :  { %1341 = vmatpush1.bf16.msra.mxu1 %v2425_v11  ;;  %1299 = vmatprep.subr.bf16.mxu0 %v2426_v12  ;;  %v2440_v21 = vld [vmem:[#allocation2 + $0x244] ss:$16 sps:$4 sm:$0xff]   ;;  %v2443_v23 = vld [vmem:[#allocation2 + $0x240] ss:$16 sps:$4 sm:$0xff]   ;;  %v2805_v11 = vmov 0  }
  0x1b   :  { %1342 = vmatprep.subr.bf16.mxu1 %v2428_v13  ;;  %v2444_v24 = vld [vmem:[#allocation2 + $0x24] ss:$16 sps:$4 sm:$0xff]   ;;  %v2448_v26 = vld [vmem:[#allocation2 + $0x20] ss:$16 sps:$4 sm:$0xff]   ;;  %v2519_v13 = vld [vmem:[#allocation2 + $0xe8] ss:$16 sps:$4 sm:$0xff]  }
  0x1c   :  { %v2446_v25 = vld [vmem:[#allocation2 + $0x224] ss:$16 sps:$4 sm:$0xff]   ;;  %v2449_v27 = vld [vmem:[#allocation2 + $0x220] ss:$16 sps:$4 sm:$0xff]  }
  0x1d   :  { %1300 = vmatpush1.bf16.msra.mxu0 %v2430_v14  ;;  %v2450_v28 = vld [vmem:[#allocation2 + $0x4] ss:$16 sps:$4 sm:$0xff]   ;;  %v2454_v30 = vld [vmem:[#allocation2] ss:$16 sps:$4 sm:$0xff]  }
  0x1e   :  { %1343 = vmatpush1.bf16.msra.mxu1 %v2431_v15  ;;  %1301 = vmatprep.subr.bf16.mxu0 %v2432_v16  ;;  %v2452_v29 = vld [vmem:[#allocation2 + $0x204] ss:$16 sps:$4 sm:$0xff]   ;;  %v2455_v31 = vld [vmem:[#allocation2 + $0x200] ss:$16 sps:$4 sm:$0xff]   ;;  %v2528_v16 = vld [vmem:[#allocation2 + $0xcc] ss:$16 sps:$4 sm:$0xff]  }
  0x1f   :  { %1344 = vmatprep.subr.bf16.mxu1 %v2434_v17  ;;  %v2456_v32 = vld [vmem:[#allocation2 + $0x1e4] ss:$16 sps:$4 sm:$0xff]   ;;  %v2460_v34 = vld [vmem:[#allocation2 + $0x1e0] ss:$16 sps:$4 sm:$0xff]  }
  0x20   :  { %v2458_v33 = vld [vmem:[#allocation2 + $0x3e4] ss:$16 sps:$4 sm:$0xff]   ;;  %v2461_v35 = vld [vmem:[#allocation2 + $0x3e0] ss:$16 sps:$4 sm:$0xff]  }
  0x21   :  { %1302 = vmatpush1.bf16.msra.mxu0 %v2436_v18  ;;  %v2462_v36 = vld [vmem:[#allocation2 + $0x1c4] ss:$16 sps:$4 sm:$0xff]   ;;  %v2466_v38 = vld [vmem:[#allocation2 + $0x1c0] ss:$16 sps:$4 sm:$0xff]   ;;  %v2526_v18 = vld [vmem:[#allocation2 + $0xc8] ss:$16 sps:$4 sm:$0xff]  }
  0x22   :  { %1345 = vmatpush1.bf16.msra.mxu1 %v2437_v19  ;;  %1303 = vmatprep.subr.bf16.mxu0 %v2438_v20  ;;  %v2464_v37 = vld [vmem:[#allocation2 + $0x3c4] ss:$16 sps:$4 sm:$0xff]   ;;  %v2467_v39 = vld [vmem:[#allocation2 + $0x3c0] ss:$16 sps:$4 sm:$0xff]   ;;  %v2534_v20 = vld [vmem:[#allocation2 + $0xac] ss:$16 sps:$4 sm:$0xff]  }
  0x23   :  { %1346 = vmatprep.subr.bf16.mxu1 %v2440_v21  ;;  %v2468_v40 = vld [vmem:[#allocation2 + $0x1a4] ss:$16 sps:$4 sm:$0xff]   ;;  %v2472_v42 = vld [vmem:[#allocation2 + $0x1a0] ss:$16 sps:$4 sm:$0xff]  }
  0x24   :  { %v2470_v41 = vld [vmem:[#allocation2 + $0x3a4] ss:$16 sps:$4 sm:$0xff]   ;;  %v2473_v43 = vld [vmem:[#allocation2 + $0x3a0] ss:$16 sps:$4 sm:$0xff]  }
  0x25   :  { %1304 = vmatpush1.bf16.msra.mxu0 %v2442_v22  ;;  %v2474_v44 = vld [vmem:[#allocation2 + $0x184] ss:$16 sps:$4 sm:$0xff]   ;;  %v2478_v46 = vld [vmem:[#allocation2 + $0x180] ss:$16 sps:$4 sm:$0xff]   ;;  %v2532_v22 = vld [vmem:[#allocation2 + $0xa8] ss:$16 sps:$4 sm:$0xff]  }
  0x26   :  { %1347 = vmatpush1.bf16.msra.mxu1 %v2443_v23  ;;  %1305 = vmatprep.subr.bf16.mxu0 %v2444_v24  ;;  %v2476_v45 = vld [vmem:[#allocation2 + $0x384] ss:$16 sps:$4 sm:$0xff]   ;;  %v2479_v47 = vld [vmem:[#allocation2 + $0x380] ss:$16 sps:$4 sm:$0xff]   ;;  %v2540_v24 = vld [vmem:[#allocation2 + $0x8c] ss:$16 sps:$4 sm:$0xff]  }
  0x27   :  { %1348 = vmatprep.subr.bf16.mxu1 %v2446_v25  ;;  %v2480_v48 = vld [vmem:[#allocation2 + $0x164] ss:$16 sps:$4 sm:$0xff]   ;;  %v2484_v52 = vld [vmem:[#allocation2 + $0x160] ss:$16 sps:$4 sm:$0xff]  }
  0x28   :  { %v2859_v49 = vld [vmem:[%s3038_s0 + $0x4] ss:$28 sps:$4 sm:$0xff]   ;;  %v2884_v14 = vld [vmem:[%s3038_s0 + $0x18] ss:$28 sps:$4 sm:$0xff]  }
  0x29   :  { %1306 = vmatpush1.bf16.msra.mxu0 %v2448_v26  ;;  %v2482_v50 = vld [vmem:[#allocation2 + $0x364] ss:$16 sps:$4 sm:$0xff]   ;;  %1325 = vmatprep.mubr.bf16.mxu0 %v2859_v49  ;;  %v2485_v53 = vld [vmem:[#allocation2 + $0x360] ss:$16 sps:$4 sm:$0xff]   ;;  %v2538_v26 = vld [vmem:[#allocation2 + $0x88] ss:$16 sps:$4 sm:$0xff]  }
  0x2a   :  { %1349 = vmatpush1.bf16.msra.mxu1 %v2449_v27  ;;  %1307 = vmatprep.subr.bf16.mxu0 %v2450_v28  ;;  %v2486_v54 = vld [vmem:[#allocation2 + $0x144] ss:$16 sps:$4 sm:$0xff]   ;;  %v2490_v56 = vld [vmem:[#allocation2 + $0x140] ss:$16 sps:$4 sm:$0xff]   ;;  %v2546_v28 = vld [vmem:[#allocation2 + $0x6c] ss:$16 sps:$4 sm:$0xff]  }
  0x2b   :  { %1350 = vmatprep.subr.bf16.mxu1 %v2452_v29  ;;  %v2488_v55 = vld [vmem:[#allocation2 + $0x344] ss:$16 sps:$4 sm:$0xff]   ;;  %v2491_v57 = vld [vmem:[#allocation2 + $0x340] ss:$16 sps:$4 sm:$0xff]  }
  0x2c   :  { %v2492_v58 = vld [vmem:[#allocation2 + $0x124] ss:$16 sps:$4 sm:$0xff]   ;;  %v2496_v60 = vld [vmem:[#allocation2 + $0x120] ss:$16 sps:$4 sm:$0xff]  }
  0x2d   :  { %1308 = vmatpush1.bf16.msra.mxu0 %v2454_v30  ;;  %v2494_v59 = vld [vmem:[#allocation2 + $0x324] ss:$16 sps:$4 sm:$0xff]   ;;  %v2497_v61 = vld [vmem:[#allocation2 + $0x320] ss:$16 sps:$4 sm:$0xff]   ;;  %v2544_v30 = vld [vmem:[#allocation2 + $0x68] ss:$16 sps:$4 sm:$0xff]  }
  0x2e   :  { %1351 = vmatpush1.bf16.msra.mxu1 %v2455_v31  ;;  %1309 = vmatprep.subr.bf16.mxu0 %v2456_v32  ;;  %v2498_v62 = vld [vmem:[#allocation2 + $0x104] ss:$16 sps:$4 sm:$0xff]   ;;  %v2502_v0 = vld [vmem:[#allocation2 + $0x100] ss:$16 sps:$4 sm:$0xff]   ;;  %v2552_v32 = vld [vmem:[#allocation2 + $0x4c] ss:$16 sps:$4 sm:$0xff]  }
  0x2f   :  { %1352 = vmatprep.subr.bf16.mxu1 %v2458_v33  ;;  %v2500_v63 = vld [vmem:[#allocation2 + $0x304] ss:$16 sps:$4 sm:$0xff]   ;;  %v2503_v1 = vld [vmem:[#allocation2 + $0x300] ss:$16 sps:$4 sm:$0xff]  }
  0x30   :  { %v2512_v2 = vld [vmem:[#allocation2 + $0x4e4] ss:$16 sps:$4 sm:$0xff]   ;;  %v2871_v4 = vld [vmem:[%s3038_s0] ss:$28 sps:$4 sm:$0xff]  }
  0x31   :  { %1310 = vmatpush2.bf16.msra.mxu0 %v2460_v34  ;;  %v2515_v3 = vld [vmem:[#allocation2 + $0x604] ss:$16 sps:$4 sm:$0xff]   ;;  %v2510_v6 = vld [vmem:[#allocation2 + $0x4e0] ss:$16 sps:$4 sm:$0xff]  }
  0x32   :  { %1353 = vmatpush2.bf16.msra.mxu1 %v2461_v35  ;;  %1311 = vmatprep.subr.bf16.mxu0 %v2462_v36  ;;  %v2876_v5 = vld [vmem:[%s3038_s0 + $0x8] ss:$28 sps:$4 sm:$0xff]   ;;  %v2513_v7 = vld [vmem:[#allocation2 + $0x600] ss:$16 sps:$4 sm:$0xff]  }
  0x33   :  { %1354 = vmatprep.subr.bf16.mxu1 %v2464_v37  ;;  %v2518_v8 = vld [vmem:[#allocation2 + $0x4c4] ss:$16 sps:$4 sm:$0xff]   ;;  %v2516_v10 = vld [vmem:[#allocation2 + $0x4c0] ss:$16 sps:$4 sm:$0xff]   ;;  %v2550_v35 = vld [vmem:[#allocation2 + $0x48] ss:$16 sps:$4 sm:$0xff]  }
  0x34   :  { %v2524_v12 = vld [vmem:[#allocation2 + $0x4a4] ss:$16 sps:$4 sm:$0xff]   ;;  %v2522_v15 = vld [vmem:[#allocation2 + $0x4a0] ss:$16 sps:$4 sm:$0xff]   ;;  %v2558_v37 = vld [vmem:[#allocation2 + $0x2c] ss:$16 sps:$4 sm:$0xff]  }
  0x35   :  { %1312 = vmatpush2.bf16.msra.mxu0 %v2466_v38  ;;  %v2531_v17 = vld [vmem:[#allocation2 + $0x484] ss:$16 sps:$4 sm:$0xff]   ;;  %v2529_v19 = vld [vmem:[#allocation2 + $0x480] ss:$16 sps:$4 sm:$0xff]  }
  0x36   :  { %1355 = vmatpush2.bf16.msra.mxu1 %v2467_v39  ;;  %1313 = vmatprep.subr.bf16.mxu0 %v2468_v40  ;;  %v2537_v21 = vld [vmem:[#allocation2 + $0x464] ss:$16 sps:$4 sm:$0xff]   ;;  %v2535_v23 = vld [vmem:[#allocation2 + $0x460] ss:$16 sps:$4 sm:$0xff]   ;;  %v2556_v39 = vld [vmem:[#allocation2 + $0x28] ss:$16 sps:$4 sm:$0xff]  }
  0x37   :  { %1356 = vmatprep.subr.bf16.mxu1 %v2470_v41  ;;  %v2543_v25 = vld [vmem:[#allocation2 + $0x444] ss:$16 sps:$4 sm:$0xff]   ;;  %v2541_v27 = vld [vmem:[#allocation2 + $0x440] ss:$16 sps:$4 sm:$0xff]   ;;  %v2564_v41 = vld [vmem:[#allocation2 + $0xc] ss:$16 sps:$4 sm:$0xff]  }
  0x38   :  { %v2549_v29 = vld [vmem:[#allocation2 + $0x424] ss:$16 sps:$4 sm:$0xff]   ;;  %v2547_v31 = vld [vmem:[#allocation2 + $0x420] ss:$16 sps:$4 sm:$0xff]  }
  0x39   :  { %1314 = vmatpush2.bf16.msra.mxu0 %v2472_v42  ;;  %v2892_v33 = vld [vmem:[%s3038_s0 + $0x14] ss:$28 sps:$4 sm:$0xff]  }
  0x3a   :  { %1357 = vmatpush2.bf16.msra.mxu1 %v2473_v43  ;;  %1315 = vmatprep.subr.bf16.mxu0 %v2474_v44  ;;  %v2555_v34 = vld [vmem:[#allocation2 + $0x404] ss:$16 sps:$4 sm:$0xff]   ;;  %v2553_v36 = vld [vmem:[#allocation2 + $0x400] ss:$16 sps:$4 sm:$0xff]   ;;  %v2562_v43 = vld [vmem:[#allocation2 + $0x8] ss:$16 sps:$4 sm:$0xff]  }
  0x3b   :  { %1358 = vmatprep.subr.bf16.mxu1 %v2476_v45  ;;  %v2561_v38 = vld [vmem:[#allocation2 + $0x5e4] ss:$16 sps:$4 sm:$0xff]   ;;  %v2559_v40 = vld [vmem:[#allocation2 + $0x5e0] ss:$16 sps:$4 sm:$0xff]   ;;  %v2570_v45 = vld [vmem:[#allocation2 + $0x1ec] ss:$16 sps:$4 sm:$0xff]  }
  0x3c   :  { %v2567_v42 = vld [vmem:[#allocation2 + $0x5c4] ss:$16 sps:$4 sm:$0xff]   ;;  %v2565_v44 = vld [vmem:[#allocation2 + $0x5c0] ss:$16 sps:$4 sm:$0xff]  }
  0x3d   :  { %1316 = vmatpush2.bf16.msra.mxu0 %v2478_v46  ;;  %v2573_v46 = vld [vmem:[#allocation2 + $0x5a4] ss:$16 sps:$4 sm:$0xff]  }
  0x3e   :  { %1359 = vmatpush2.bf16.msra.mxu1 %v2479_v47  ;;  %1317 = vmatprep.subr.bf16.mxu0 %v2480_v48  ;;  %v2568_v47 = vld [vmem:[#allocation2 + $0x1e8] ss:$16 sps:$4 sm:$0xff]   ;;  %v2571_v48 = vld [vmem:[#allocation2 + $0x5a0] ss:$16 sps:$4 sm:$0xff]  }
  0x3f   :  { %1360 = vmatprep.subr.bf16.mxu1 %v2482_v50  ;;  %v2579_v50 = vld [vmem:[#allocation2 + $0x584] ss:$16 sps:$4 sm:$0xff]  }
  0x41   :  { %1318 = vmatpush2.bf16.msra.mxu0 %v2484_v52  ;;  %v2574_v52 = vld [vmem:[#allocation2 + $0x1c8] ss:$16 sps:$4 sm:$0xff]  }
  0x42   :  { %1361 = vmatpush2.bf16.msra.mxu1 %v2485_v53  ;;  %1319 = vmatprep.subr.bf16.mxu0 %v2486_v54  ;;  %v2577_v53 = vld [vmem:[#allocation2 + $0x580] ss:$16 sps:$4 sm:$0xff]   ;;  %v2582_v54 = vld [vmem:[#allocation2 + $0x1ac] ss:$16 sps:$4 sm:$0xff]  }
  0x43   :  { %1362 = vmatprep.subr.bf16.mxu1 %v2488_v55  ;;  %v2585_v55 = vld [vmem:[#allocation2 + $0x564] ss:$16 sps:$4 sm:$0xff]  }
  0x45   :  { %1320 = vmatpush2.bf16.msra.mxu0 %v2490_v56  ;;  %v2580_v56 = vld [vmem:[#allocation2 + $0x1a8] ss:$16 sps:$4 sm:$0xff]  }
  0x46   :  { %1363 = vmatpush2.bf16.msra.mxu1 %v2491_v57  ;;  %1321 = vmatprep.subr.bf16.mxu0 %v2492_v58  ;;  %v2583_v57 = vld [vmem:[#allocation2 + $0x560] ss:$16 sps:$4 sm:$0xff]   ;;  %v2588_v58 = vld [vmem:[#allocation2 + $0x18c] ss:$16 sps:$4 sm:$0xff]  }
  0x47   :  { %1364 = vmatprep.subr.bf16.mxu1 %v2494_v59  ;;  %v2591_v59 = vld [vmem:[#allocation2 + $0x544] ss:$16 sps:$4 sm:$0xff]  }
  0x49   :  { %1322 = vmatpush2.bf16.msra.mxu0 %v2496_v60  ;;  %v2586_v60 = vld [vmem:[#allocation2 + $0x188] ss:$16 sps:$4 sm:$0xff]  }
  0x4a   :  { %1365 = vmatpush2.bf16.msra.mxu1 %v2497_v61  ;;  %1323 = vmatprep.subr.bf16.mxu0 %v2498_v62  ;;  %v2589_v61 = vld [vmem:[#allocation2 + $0x540] ss:$16 sps:$4 sm:$0xff]   ;;  %v2594_v62 = vld [vmem:[#allocation2 + $0x16c] ss:$16 sps:$4 sm:$0xff]  }
  0x4b   :  { %1366 = vmatprep.subr.bf16.mxu1 %v2500_v63  ;;  %v2597_v63 = vld [vmem:[#allocation2 + $0x524] ss:$16 sps:$4 sm:$0xff]  }
  0x4d   :  { %1324 = vmatpush2.bf16.msra.mxu0 %v2502_v0  ;;  %v2592_v0 = vld [vmem:[#allocation2 + $0x168] ss:$16 sps:$4 sm:$0xff]  }
  0x4e   :  { %1367 = vmatpush2.bf16.msra.mxu1 %v2503_v1  ;;  %1379 = vmatprep.subr.bf16.mxu0 %v2512_v2  ;;  %v2595_v1 = vld [vmem:[#allocation2 + $0x520] ss:$16 sps:$4 sm:$0xff]   ;;  %v2600_v2 = vld [vmem:[#allocation2 + $0x14c] ss:$16 sps:$4 sm:$0xff]  }
  0x4f   :  { %1436 = vmatprep.subr.bf16.mxu1 %v2515_v3  ;;  %v2603_v3 = vld [vmem:[#allocation2 + $0x504] ss:$16 sps:$4 sm:$0xff]  }
  0x50   :  { %1326 = vmatmul.mubr.bf16.vlgmr.msra.gmra.mxu0 %v2871_v4 }
  0x51   :  { %1369 = vmatmul.mubr.bf16.vlgmr.msra.gmra.mxu1 %v2876_v5  ;;  %1380 = vmatpush1.bf16.msra.mxu0 %v2510_v6  ;;  %v2598_v6 = vld [vmem:[#allocation2 + $0x148] ss:$16 sps:$4 sm:$0xff]  }
  0x52   :  { %1437 = vmatpush1.bf16.msra.mxu1 %v2513_v7  ;;  %1381 = vmatprep.subr.bf16.mxu0 %v2518_v8  ;;  %v2601_v7 = vld [vmem:[#allocation2 + $0x500] ss:$16 sps:$4 sm:$0xff]   ;;  %v2609_v8 = vld [vmem:[#allocation2 + $0x12c] ss:$16 sps:$4 sm:$0xff]  }
  0x53   :  { %1454 = vmatprep.mubr.bf16.mxu1 %v2805_v11  ;;  %1465 = vmatprep.subr.bf16.mxu1 %v2521_v9  ;;  %v2612_v9 = vld [vmem:[#allocation2 + $0x2ec] ss:$16 sps:$4 sm:$0xff]  }
  0x54   :  { %1411 = vmatprep.mubr.bf16.mxu0 %v2892_v33 }
  0x55   :  { %1382 = vmatpush1.bf16.msra.mxu0 %v2516_v10  ;;  %v2898_v10 = vld [vmem:[%s3038_s0 + $0x10] ss:$28 sps:$4 sm:$0xff]  }
  0x56   :  { %1383 = vmatprep.subr.bf16.mxu0 %v2524_v12  ;;  %v2607_v12 = vld [vmem:[#allocation2 + $0x128] ss:$16 sps:$4 sm:$0xff]  }
  0x59   :  { %2313 = vmatmul.mubr.msk.bf16.vlgmr.msra.gmra.mxu1 %vm1289_vm0, %v2884_v14  ;;  %1384 = vmatpush1.bf16.msra.mxu0 %v2522_v15  ;;  %v2615_v15 = vld [vmem:[#allocation2 + $0x10c] ss:$16 sps:$4 sm:$0xff]  }
  0x5a   :  { %1466 = vmatpush1.bf16.msra.mxu1 %v2519_v13  ;;  %1385 = vmatprep.subr.bf16.mxu0 %v2531_v17  ;;  %v2610_v13 = vld [vmem:[#allocation2 + $0x2e8] ss:$16 sps:$4 sm:$0xff]  }
  0x5b   :  { %1467 = vmatprep.subr.bf16.mxu1 %v2528_v16  ;;  %1497 = vmatprep.mubr.bf16.mxu1 %v2859_v49  ;;  %v2576_v49 = vld [vmem:[#allocation2 + $0x1cc] ss:$16 sps:$4 sm:$0xff]   ;;  %v2613_v17 = vld [vmem:[#allocation2 + $0x108] ss:$16 sps:$4 sm:$0xff]  }
  0x5c   :  { %v2618_v16 = vld [vmem:[#allocation2 + $0x2cc] ss:$16 sps:$4 sm:$0xff]  }
  0x5d   :  { %1386 = vmatpush1.bf16.msra.mxu0 %v2529_v19  ;;  %v2621_v19 = vld [vmem:[#allocation2 + $0x4ec] ss:$16 sps:$4 sm:$0xff]  }
  0x5e   :  { %1468 = vmatpush1.bf16.msra.mxu1 %v2526_v18  ;;  %1387 = vmatprep.subr.bf16.mxu0 %v2537_v21  ;;  %v2616_v18 = vld [vmem:[#allocation2 + $0x2c8] ss:$16 sps:$4 sm:$0xff]  }
  0x5f   :  { %1469 = vmatprep.subr.bf16.mxu1 %v2534_v20  ;;  %v2624_v20 = vld [vmem:[#allocation2 + $0x2ac] ss:$16 sps:$4 sm:$0xff]   ;;  %v2619_v21 = vld [vmem:[#allocation2 + $0x4e8] ss:$16 sps:$4 sm:$0xff]  }
  0x61   :  { %1388 = vmatpush1.bf16.msra.mxu0 %v2535_v23  ;;  %v2627_v23 = vld [vmem:[#allocation2 + $0x4cc] ss:$16 sps:$4 sm:$0xff]  }
  0x62   :  { %1470 = vmatpush1.bf16.msra.mxu1 %v2532_v22  ;;  %1389 = vmatprep.subr.bf16.mxu0 %v2543_v25  ;;  %v2622_v22 = vld [vmem:[#allocation2 + $0x2a8] ss:$16 sps:$4 sm:$0xff]  }
  0x63   :  { %1471 = vmatprep.subr.bf16.mxu1 %v2540_v24  ;;  %v2630_v24 = vld [vmem:[#allocation2 + $0x28c] ss:$16 sps:$4 sm:$0xff]   ;;  %v2625_v25 = vld [vmem:[#allocation2 + $0x4c8] ss:$16 sps:$4 sm:$0xff]  }
  0x65   :  { %1390 = vmatpush1.bf16.msra.mxu0 %v2541_v27  ;;  %v2633_v27 = vld [vmem:[#allocation2 + $0x4ac] ss:$16 sps:$4 sm:$0xff]  }
  0x66   :  { %1472 = vmatpush1.bf16.msra.mxu1 %v2538_v26  ;;  %1391 = vmatprep.subr.bf16.mxu0 %v2549_v29  ;;  %v2628_v26 = vld [vmem:[#allocation2 + $0x288] ss:$16 sps:$4 sm:$0xff]  }
  0x67   :  { %1473 = vmatprep.subr.bf16.mxu1 %v2546_v28  ;;  %v2636_v28 = vld [vmem:[#allocation2 + $0x26c] ss:$16 sps:$4 sm:$0xff]   ;;  %v2631_v29 = vld [vmem:[#allocation2 + $0x4a8] ss:$16 sps:$4 sm:$0xff]  }
  0x69   :  { %1392 = vmatpush1.bf16.msra.mxu0 %v2547_v31  ;;  %v2642_v31 = vld [vmem:[#allocation2 + $0x24c] ss:$16 sps:$4 sm:$0xff]  }
  0x6a   :  { %1474 = vmatpush1.bf16.msra.mxu1 %v2544_v30  ;;  %1393 = vmatprep.subr.bf16.mxu0 %v2555_v34  ;;  %v2634_v30 = vld [vmem:[#allocation2 + $0x268] ss:$16 sps:$4 sm:$0xff]  }
  0x6b   :  { %1475 = vmatprep.subr.bf16.mxu1 %v2552_v32  ;;  %v2637_v32 = vld [vmem:[#allocation2 + $0x488] ss:$16 sps:$4 sm:$0xff]  }
  0x6c   :  { %v2640_v34 = vld [vmem:[#allocation2 + $0x248] ss:$16 sps:$4 sm:$0xff]  }
  0x6d   :  { %1394 = vmatpush1.bf16.msra.mxu0 %v2553_v36  ;;  %v2643_v36 = vld [vmem:[#allocation2 + $0x468] ss:$16 sps:$4 sm:$0xff]  }
  0x6e   :  { %1476 = vmatpush1.bf16.msra.mxu1 %v2550_v35  ;;  %1395 = vmatprep.subr.bf16.mxu0 %v2561_v38  ;;  %v2645_v35 = vld [vmem:[#allocation2 + $0x46c] ss:$16 sps:$4 sm:$0xff]  }
  0x6f   :  { %1477 = vmatprep.subr.bf16.mxu1 %v2558_v37  ;;  %v2646_v37 = vld [vmem:[#allocation2 + $0x228] ss:$16 sps:$4 sm:$0xff]   ;;  %v2651_v38 = vld [vmem:[#allocation2 + $0x44c] ss:$16 sps:$4 sm:$0xff]  }
  0x71   :  { %1396 = vmatpush2.bf16.msra.mxu0 %v2559_v40  ;;  %v2652_v40 = vld [vmem:[#allocation2 + $0x208] ss:$16 sps:$4 sm:$0xff]  }
  0x72   :  { %1478 = vmatpush1.bf16.msra.mxu1 %v2556_v39  ;;  %1397 = vmatprep.subr.bf16.mxu0 %v2567_v42  ;;  %v2654_v39 = vld [vmem:[#allocation2 + $0x20c] ss:$16 sps:$4 sm:$0xff]  }
  0x73   :  { %1479 = vmatprep.subr.bf16.mxu1 %v2564_v41  ;;  %v2657_v41 = vld [vmem:[#allocation2 + $0x42c] ss:$16 sps:$4 sm:$0xff]  }
  0x74   :  { %v2660_v42 = vld [vmem:[#allocation2 + $0x3ec] ss:$16 sps:$4 sm:$0xff]  }
  0x75   :  { %1398 = vmatpush2.bf16.msra.mxu0 %v2565_v44  ;;  %v2658_v44 = vld [vmem:[#allocation2 + $0x3e8] ss:$16 sps:$4 sm:$0xff]  }
  0x76   :  { %1480 = vmatpush1.bf16.msra.mxu1 %v2562_v43  ;;  %1399 = vmatprep.subr.bf16.mxu0 %v2573_v46  ;;  %v2655_v43 = vld [vmem:[#allocation2 + $0x428] ss:$16 sps:$4 sm:$0xff]   ;;  %v2666_v46 = vld [vmem:[#allocation2 + $0x3cc] ss:$16 sps:$4 sm:$0xff]  }
  0x77   :  { %1481 = vmatprep.subr.bf16.mxu1 %v2570_v45  ;;  %v2663_v45 = vld [vmem:[#allocation2 + $0x40c] ss:$16 sps:$4 sm:$0xff]  }
  0x79   :  { %1400 = vmatpush2.bf16.msra.mxu0 %v2571_v48  ;;  %v2664_v48 = vld [vmem:[#allocation2 + $0x3c8] ss:$16 sps:$4 sm:$0xff]  }
  0x7a   :  { %1482 = vmatpush2.bf16.msra.mxu1 %v2568_v47  ;;  %1401 = vmatprep.subr.bf16.mxu0 %v2579_v50  ;;  %v2661_v47 = vld [vmem:[#allocation2 + $0x408] ss:$16 sps:$4 sm:$0xff]   ;;  %v2672_v50 = vld [vmem:[#allocation2 + $0x3ac] ss:$16 sps:$4 sm:$0xff]  }
  0x7b   :  { %1483 = vmatprep.subr.bf16.mxu1 %v2576_v49  ;;  %v2669_v49 = vld [vmem:[#allocation2 + $0x5ec] ss:$16 sps:$4 sm:$0xff]  }
  0x7d   :  { %1402 = vmatpush2.bf16.msra.mxu0 %v2577_v53  ;;  %v2670_v53 = vld [vmem:[#allocation2 + $0x3a8] ss:$16 sps:$4 sm:$0xff]  }
  0x7e   :  { %1484 = vmatpush2.bf16.msra.mxu1 %v2574_v52  ;;  %1403 = vmatprep.subr.bf16.mxu0 %v2585_v55  ;;  %v2667_v52 = vld [vmem:[#allocation2 + $0x5e8] ss:$16 sps:$4 sm:$0xff]   ;;  %v2678_v55 = vld [vmem:[#allocation2 + $0x38c] ss:$16 sps:$4 sm:$0xff]  }
  0x7f   :  { %1485 = vmatprep.subr.bf16.mxu1 %v2582_v54  ;;  %v2675_v54 = vld [vmem:[#allocation2 + $0x5cc] ss:$16 sps:$4 sm:$0xff]  }
  0x81   :  { %1404 = vmatpush2.bf16.msra.mxu0 %v2583_v57  ;;  %v2676_v57 = vld [vmem:[#allocation2 + $0x388] ss:$16 sps:$4 sm:$0xff]  }
  0x82   :  { %1486 = vmatpush2.bf16.msra.mxu1 %v2580_v56  ;;  %1405 = vmatprep.subr.bf16.mxu0 %v2591_v59  ;;  %v2673_v56 = vld [vmem:[#allocation2 + $0x5c8] ss:$16 sps:$4 sm:$0xff]   ;;  %v2684_v59 = vld [vmem:[#allocation2 + $0x36c] ss:$16 sps:$4 sm:$0xff]  }
  0x83   :  { %1487 = vmatprep.subr.bf16.mxu1 %v2588_v58  ;;  %v2681_v58 = vld [vmem:[#allocation2 + $0x5ac] ss:$16 sps:$4 sm:$0xff]  }
  0x85   :  { %1406 = vmatpush2.bf16.msra.mxu0 %v2589_v61  ;;  %v2682_v61 = vld [vmem:[#allocation2 + $0x368] ss:$16 sps:$4 sm:$0xff]  }
  0x86   :  { %1488 = vmatpush2.bf16.msra.mxu1 %v2586_v60  ;;  %1407 = vmatprep.subr.bf16.mxu0 %v2597_v63  ;;  %v2679_v60 = vld [vmem:[#allocation2 + $0x5a8] ss:$16 sps:$4 sm:$0xff]   ;;  %v2690_v63 = vld [vmem:[#allocation2 + $0x34c] ss:$16 sps:$4 sm:$0xff]  }
  0x87   :  { %1489 = vmatprep.subr.bf16.mxu1 %v2594_v62  ;;  %v2687_v62 = vld [vmem:[#allocation2 + $0x58c] ss:$16 sps:$4 sm:$0xff]  }
  0x89   :  { %1408 = vmatpush2.bf16.msra.mxu0 %v2595_v1  ;;  %v2688_v1 = vld [vmem:[#allocation2 + $0x348] ss:$16 sps:$4 sm:$0xff]  }
  0x8a   :  { %1490 = vmatpush2.bf16.msra.mxu1 %v2592_v0  ;;  %1409 = vmatprep.subr.bf16.mxu0 %v2603_v3  ;;  %v2685_v0 = vld [vmem:[#allocation2 + $0x588] ss:$16 sps:$4 sm:$0xff]   ;;  %v2696_v3 = vld [vmem:[#allocation2 + $0x32c] ss:$16 sps:$4 sm:$0xff]  }
  0x8b   :  { %1491 = vmatprep.subr.bf16.mxu1 %v2600_v2  ;;  %v2693_v2 = vld [vmem:[#allocation2 + $0x56c] ss:$16 sps:$4 sm:$0xff]  }
  0x8d   :  { %1410 = vmatpush2.bf16.msra.mxu0 %v2601_v7  ;;  %v2694_v7 = vld [vmem:[#allocation2 + $0x328] ss:$16 sps:$4 sm:$0xff]  }
  0x8e   :  { %1492 = vmatpush2.bf16.msra.mxu1 %v2598_v6  ;;  %1508 = vmatprep.subr.bf16.mxu0 %v2612_v9  ;;  %v2691_v6 = vld [vmem:[#allocation2 + $0x568] ss:$16 sps:$4 sm:$0xff]   ;;  %v2702_v9 = vld [vmem:[#allocation2 + $0x30c] ss:$16 sps:$4 sm:$0xff]  }
  0x8f   :  { %1493 = vmatprep.subr.bf16.mxu1 %v2609_v8  ;;  %v2699_v8 = vld [vmem:[#allocation2 + $0x54c] ss:$16 sps:$4 sm:$0xff]  }
  0x90   :  { %1412 = vmatmul.mubr.bf16.vlgmr.msra.gmra.mxu0 %v2898_v10 }
  0x91   :  { %1509 = vmatpush1.bf16.msra.mxu0 %v2610_v13  ;;  %1540 = vmatprep.mubr.bf16.mxu0 %v2864_v51  ;;  %v2639_v51 = vld [vmem:[#allocation2 + $0x48c] ss:$16 sps:$4 sm:$0xff]   ;;  %v2700_v13 = vld [vmem:[#allocation2 + $0x308] ss:$16 sps:$4 sm:$0xff]  }
  0x92   :  { %1494 = vmatpush2.bf16.msra.mxu1 %v2607_v12  ;;  %1510 = vmatprep.subr.bf16.mxu0 %v2618_v16  ;;  %v2697_v12 = vld [vmem:[#allocation2 + $0x548] ss:$16 sps:$4 sm:$0xff]   ;;  %v2708_v16 = vld [vmem:[#allocation2 + $0x60c] ss:$16 sps:$4 sm:$0xff]  }
  0x93   :  { %1495 = vmatprep.subr.bf16.mxu1 %v2615_v15  ;;  %v2705_v15 = vld [vmem:[#allocation2 + $0x52c] ss:$16 sps:$4 sm:$0xff]  }
  0x95   :  { %1511 = vmatpush1.bf16.msra.mxu0 %v2616_v18  ;;  %v2706_v18 = vld [vmem:[#allocation2 + $0x608] ss:$16 sps:$4 sm:$0xff]  }
  0x96   :  { %1496 = vmatpush2.bf16.msra.mxu1 %v2613_v17  ;;  %1512 = vmatprep.subr.bf16.mxu0 %v2624_v20  ;;  %v2703_v17 = vld [vmem:[#allocation2 + $0x528] ss:$16 sps:$4 sm:$0xff]  }
  0x97   :  { %1551 = vmatprep.subr.bf16.mxu1 %v2621_v19  ;;  %v2711_v19 = vld [vmem:[#allocation2 + $0x50c] ss:$16 sps:$4 sm:$0xff]  }
  0x98   :  { %v2712_v20 = vld [vmem:[%s3041_s3 + $0x78] sm:$0xff]  }
  0x99   :  { %1498 = vmatmul.mubr.bf16.vlgmr.msra.gmra.mxu1 %v2871_v4  ;;  %1513 = vmatpush1.bf16.msra.mxu0 %v2622_v22  ;;  %v2648_v4 = vld [vmem:[#allocation2 + $0x22c] ss:$16 sps:$4 sm:$0xff]  }
  0x9a   :  { %1552 = vmatpush1.bf16.msra.mxu1 %v2619_v21  ;;  %1514 = vmatprep.subr.bf16.mxu0 %v2630_v24  ;;  %v2709_v21 = vld [vmem:[#allocation2 + $0x508] ss:$16 sps:$4 sm:$0xff]  }
  0x9b   :  { %1553 = vmatprep.subr.bf16.mxu1 %v2627_v23  ;;  %1583 = vmatprep.mubr.bf16.mxu1 %v2892_v33  ;;  %v2649_v33 = vld [vmem:[#allocation2 + $0x448] ss:$16 sps:$4 sm:$0xff]   ;;  %v2714_v23 = vld [vmem:[%s3041_s3 + $0x70] sm:$0xff]  }
  0x9c   :  { %v2713_v22 = vld [vmem:[%s3041_s3 + $0x38] sm:$0xff]   ;;  %v2717_v24 = vld [vmem:[%s3041_s3 + $0x28] sm:$0xff]  }
  0x9d   :  { %1515 = vmatpush1.bf16.msra.mxu0 %v2628_v26  ;;  %v2730_v26 = vld [vmem:[%s3041_s3 + $0xf0] sm:$0xff]  }
  0x9e   :  { %1554 = vmatpush1.bf16.msra.mxu1 %v2625_v25  ;;  %1516 = vmatprep.subr.bf16.mxu0 %v2636_v28  ;;  %v2729_v25 = vld [vmem:[%s3041_s3 + $0xb8] sm:$0xff]  }
  0x9f   :  { %1555 = vmatprep.subr.bf16.mxu1 %v2633_v27  ;;  %v2719_v27 = vld [vmem:[%s3041_s3 + $0x20] sm:$0xff]   ;;  %v2720_v28 = vld [vmem:[%s3041_s3 + $0x58] sm:$0xff]  }
  0xa1   :  { %1517 = vmatpush1.bf16.msra.mxu0 %v2634_v30  ;;  %v2732_v30 = vld [vmem:[%s3041_s3 + $0xe8] sm:$0xff]  }
  0xa2   :  { %1556 = vmatpush1.bf16.msra.mxu1 %v2631_v29  ;;  %1518 = vmatprep.subr.bf16.mxu0 %v2642_v31  ;;  %v2731_v29 = vld [vmem:[%s3041_s3 + $0xb0] sm:$0xff]  }
  0xa3   :  { %1557 = vmatprep.subr.bf16.mxu1 %v2639_v51  ;;  %v2721_v51 = vld [vmem:[%s3041_s3 + $0x18] sm:$0xff]   ;;  %v2722_v31 = vld [vmem:[%s3041_s3 + $0x50] sm:$0xff]  }
  0xa5   :  { %1519 = vmatpush1.bf16.msra.mxu0 %v2640_v34  ;;  %v2724_v34 = vld [vmem:[%s3041_s3 + $0x48] sm:$0xff]  }
  0xa6   :  { %1558 = vmatpush1.bf16.msra.mxu1 %v2637_v32  ;;  %1520 = vmatprep.subr.bf16.mxu0 %v2648_v4  ;;  %v2723_v32 = vld [vmem:[%s3041_s3 + $0x10] sm:$0xff]   ;;  %v2726_v4 = vld [vmem:[%s3041_s3 + $0x40] sm:$0xff]  }
  0xa7   :  { %1559 = vmatprep.subr.bf16.mxu1 %v2645_v35  ;;  %v2725_v35 = vld [vmem:[%s3041_s3 + $0x8] sm:$0xff]  }
  0xa9   :  { %1521 = vmatpush1.bf16.msra.mxu0 %v2646_v37  ;;  %v2733_v37 = vld [vmem:[%s3041_s3 + $0xa8] sm:$0xff]  }
  0xaa   :  { %1560 = vmatpush1.bf16.msra.mxu1 %v2643_v36  ;;  %1522 = vmatprep.subr.bf16.mxu0 %v2654_v39  ;;  %v2727_v36 = vld [vmem:[%s3041_s3] sm:$0xff]  }
  0xab   :  { %1561 = vmatprep.subr.bf16.mxu1 %v2651_v38  ;;  %v2734_v38 = vld [vmem:[%s3041_s3 + $0xe0] sm:$0xff]  }
  0xac   :  { %v2735_v39 = vld [vmem:[%s3041_s3 + $0xa0] sm:$0xff]  }
  0xad   :  { %1523 = vmatpush1.bf16.msra.mxu0 %v2652_v40  ;;  %v2737_v40 = vld [vmem:[%s3041_s3 + $0x98] sm:$0xff]  }
  0xae   :  { %1562 = vmatpush1.bf16.msra.mxu1 %v2649_v33  ;;  %1524 = vmatprep.subr.bf16.mxu0 %v2660_v42  ;;  %v2736_v33 = vld [vmem:[%s3041_s3 + $0xd8] sm:$0xff]   ;;  %v2739_v42 = vld [vmem:[%s3041_s3 + $0x90] sm:$0xff]  }
  0xaf   :  { %1563 = vmatprep.subr.bf16.mxu1 %v2657_v41  ;;  %v2738_v41 = vld [vmem:[%s3041_s3 + $0xd0] sm:$0xff]  }
  0xb1   :  { %1525 = vmatpush2.bf16.msra.mxu0 %v2658_v44  ;;  %v2741_v44 = vld [vmem:[%s3041_s3 + $0x88] sm:$0xff]  }
  0xb2   :  { %1564 = vmatpush1.bf16.msra.mxu1 %v2655_v43  ;;  %1526 = vmatprep.subr.bf16.mxu0 %v2666_v46  ;;  %v2740_v43 = vld [vmem:[%s3041_s3 + $0xc8] sm:$0xff]   ;;  %v2743_v46 = vld [vmem:[%s3041_s3 + $0x80] sm:$0xff]  }
  0xb3   :  { %1565 = vmatprep.subr.bf16.mxu1 %v2663_v45  ;;  %v2742_v45 = vld [vmem:[%s3041_s3 + $0xc0] sm:$0xff]  }
  0xb5   :  { %1527 = vmatpush2.bf16.msra.mxu0 %v2664_v48  ;;  %v254_v48 = vlaneseq }
  0xb6   :  { %1566 = vmatpush1.bf16.msra.mxu1 %v2661_v47  ;;  %1528 = vmatprep.subr.bf16.mxu0 %v2672_v50 }
  0xb7   :  { %1567 = vmatprep.subr.bf16.mxu1 %v2669_v49  ;;  %v3005_v50 = vshrl.u32 %v254_v48, 7 }
  0xb9   :  { %1529 = vmatpush2.bf16.msra.mxu0 %v2670_v53  ;;  %vm2030_vm1 = vcmp.lt.s32.totalorder %v3005_v50, 2 }
  0xba   :  { %1568 = vmatpush2.bf16.msra.mxu1 %v2667_v52  ;;  %1530 = vmatprep.subr.bf16.mxu0 %v2678_v55  ;;  %v256_v55 = vsub.s32 0, %v3005_v50 }
  0xbb   :  { %1569 = vmatprep.subr.bf16.mxu1 %v2675_v54  ;;  %v260_v54 = vsub.s32 1, %v3005_v50 }
  0xbd   :  { %1531 = vmatpush2.bf16.msra.mxu0 %v2676_v57  ;;  %v252_v57 = vld [vmem:[%s3040_s2] sm:$0xf] }
  0xbe   :  { %1570 = vmatpush2.bf16.msra.mxu1 %v2673_v56  ;;  %1532 = vmatprep.subr.bf16.mxu0 %v2684_v59  ;;  %v261_v59 = vrot.slane %v252_v57, %v260_v54 }
  0xbf   :  { %1571 = vmatprep.subr.bf16.mxu1 %v2681_v58 }
  0xc1   :  { %1533 = vmatpush2.bf16.msra.mxu0 %v2682_v61 }
  0xc2   :  { %1572 = vmatpush2.bf16.msra.mxu1 %v2679_v60  ;;  %1534 = vmatprep.subr.bf16.mxu0 %v2690_v63  ;;  %v257_v60 = vrot.slane %v252_v57, %v256_v55 }
  0xc3   :  { %1573 = vmatprep.subr.bf16.mxu1 %v2687_v62 }
  0xc5   :  { %1535 = vmatpush2.bf16.msra.mxu0 %v2688_v1 }
  0xc6   :  { %1574 = vmatpush2.bf16.msra.mxu1 %v2685_v0  ;;  %1536 = vmatprep.subr.bf16.mxu0 %v2696_v3 }
  0xc7   :  { %1575 = vmatprep.subr.bf16.mxu1 %v2693_v2 }
  0xc9   :  { %1537 = vmatpush2.bf16.msra.mxu0 %v2694_v7 }
  0xca   :  { %1576 = vmatpush2.bf16.msra.mxu1 %v2691_v6  ;;  %1538 = vmatprep.subr.bf16.mxu0 %v2702_v9 }
  0xcb   :  { %1577 = vmatprep.subr.bf16.mxu1 %v2699_v8 }
  0xcd   :  { %1539 = vmatpush2.bf16.msra.mxu0 %v2700_v13 }
  0xce   :  { %1578 = vmatpush2.bf16.msra.mxu1 %v2697_v12  ;;  %1608 = vmatprep.subr.bf16.mxu0 %v2708_v16 }
  0xcf   :  { %1579 = vmatprep.subr.bf16.mxu1 %v2705_v15 }
  0xd0   :  { %1541 = vmatmul.mubr.bf16.vlgmr.msra.gmra.mxu0 %v2876_v5  ;;  %v2715_v5 = vld [vmem:[%s3041_s3 + $0x30] sm:$0xff]  }
  0xd1   :  { %1609 = vmatpush1.bf16.msra.mxu0 %v2706_v18  ;;  %1626 = vmatprep.mubr.bf16.mxu0 %v2805_v11  ;;  %v2716_v11 = vld [vmem:[%s3041_s3 + $0x68] sm:$0xff]  }
  0xd2   :  { %1580 = vmatpush2.bf16.msra.mxu1 %v2703_v17  ;;  %2350 = vmatprep.subr.bf16.mxu0 %v2712_v20 }
  0xd3   :  { %1581 = vmatprep.subr.bf16.mxu1 %v2711_v19 }
  0xd6   :  { %1582 = vmatpush2.bf16.msra.mxu1 %v2709_v21 }
  0xd8   :  { %2314 = vmatmul.mubr.msk.bf16.vlgmr.msra.gmra.mxu0 %vm1289_vm0, %v2884_v14  ;;  %v2718_v14 = vld [vmem:[%s3041_s3 + $0x60] sm:$0xff]  }
  0xd9   :  { %1584 = vmatmul.mubr.bf16.vlgmr.msra.gmra.mxu1 %v2898_v10  ;;  %2351 = vmatpush3.bf16.msra.mxu0 %v2713_v22  ;;  %v2728_v10 = vld [vmem:[%s3041_s3 + $0xf8] sm:$0xff]  }
  0xda   :  { %2352 = vmatprep.subr.bf16.mxu0 %v2714_v23  ;;  %2372 = vmatprep.subr.bf16.mxu1 %v2728_v10 }
  0xdb   :  { %2373 = vmatpush3.bf16.msra.mxu1 %v2729_v25 }
  0xdc   :  { %2374 = vmatprep.subr.bf16.mxu1 %v2730_v26 }
  0xdd   :  { %2353 = vmatpush3.bf16.msra.mxu0 %v2715_v5 }
  0xde   :  { %2354 = vmatprep.subr.bf16.mxu0 %v2716_v11 }
  0xdf   :  { %2375 = vmatpush3.bf16.msra.mxu1 %v2731_v29 }
  0xe0   :  { %2376 = vmatprep.subr.bf16.mxu1 %v2732_v30 }
  0xe1   :  { %2355 = vmatpush3.bf16.msra.mxu0 %v2717_v24 }
  0xe2   :  { %2356 = vmatprep.subr.bf16.mxu0 %v2718_v14 }
  0xe3   :  { %2377 = vmatpush3.bf16.msra.mxu1 %v2733_v37 }
  0xe4   :  { %2378 = vmatprep.subr.bf16.mxu1 %v2734_v38 }
  0xe5   :  { %2357 = vmatpush3.bf16.msra.mxu0 %v2719_v27 }
  0xe6   :  { %2358 = vmatprep.subr.bf16.mxu0 %v2720_v28 }
  0xe7   :  { %2379 = vmatpush3.bf16.msra.mxu1 %v2735_v39 }
  0xe8   :  { %2380 = vmatprep.subr.bf16.mxu1 %v2736_v33 }
  0xe9   :  { %2359 = vmatpush3.bf16.msra.mxu0 %v2721_v51 }
  0xea   :  { %2360 = vmatprep.subr.bf16.mxu0 %v2722_v31  ;;  %v268_v31 = vsub.s32 3, %v3005_v50 }
  0xeb   :  { %2381 = vmatpush3.bf16.msra.mxu1 %v2737_v40 }
  0xec   :  { %2382 = vmatprep.subr.bf16.mxu1 %v2738_v41 }
  0xed   :  { %2361 = vmatpush3.bf16.msra.mxu0 %v2723_v32  ;;  %v264_v32 = vsub.s32 2, %v3005_v50 }
  0xee   :  { %2362 = vmatprep.subr.bf16.mxu0 %v2724_v34 }
  0xef   :  { %2383 = vmatpush3.bf16.msra.mxu1 %v2739_v42  ;;  %v265_v37 = vrot.slane %v252_v57, %v264_v32 }
  0xf0   :  { %2384 = vmatprep.subr.bf16.mxu1 %v2740_v43 }
  0xf1   :  { %2363 = vmatpush3.bf16.msra.mxu0 %v2725_v35 }
  0xf2   :  { %2364 = vmatprep.subr.bf16.mxu0 %v2726_v4 }
  0xf3   :  { %2385 = vmatpush3.bf16.msra.mxu1 %v2741_v44 }
  0xf4   :  { %2386 = vmatprep.subr.bf16.mxu1 %v2742_v45 }
  0xf5   :  { %2365 = vmatpush3.bf16.msra.mxu0 %v2727_v36  ;;  %v269_v36 = vrot.slane %v252_v57, %v268_v31 }
  0xf7   :  { %2387 = vmatpush3.bf16.msra.mxu1 %v2743_v46 }
 0x110   :  { %v1327_v52 = vpop.f32.mrf.mxu0 }
 0x111   :  { %v1370_v47 = vpop.f32.mrf.mxu1  ;;  %v1328_v0 = vadd.f32 %v1327_v52, %v257_v60 }
 0x112   :  { %v1329_v56 = vpop.f32.mrf.mxu0 }
 0x113   :  { %v1372_v49 = vpop.f32.mrf.mxu1  ;;  %v1330_v63 = vadd.f32 %v1329_v56, %v261_v59  ;;  %v1371_v9 = vadd.f32 %v1370_v47, %v1328_v0 }
 0x114   :  { %v1331_v61 = vpop.f32.mrf.mxu0 }
 0x115   :  { %v1374_v53 = vpop.f32.mrf.mxu1  ;;  %v1332_v2 = vadd.f32 %v1331_v61, %v257_v60  ;;  %v1373_v7 = vadd.f32 %v1372_v49, %v1330_v63 }
 0x116   :  { %v1333_v1 = vpop.f32.mrf.mxu0 }
 0x117   :  { %v1376_v58 = vpop.f32.mrf.mxu1  ;;  %v1334_v8 = vadd.f32 %v1333_v1, %v261_v59  ;;  %v1375_v13 = vadd.f32 %v1374_v53, %v1332_v2 }
 0x119   :  { %v1456_v62 = vpop.f32.mrf.mxu1  ;;  %v1377_v19 = vadd.f32 %v1376_v58, %v1334_v8 }
 0x11b   :  { %v1458_v3 = vpop.f32.mrf.mxu1 }
 0x11d   :  { %v1460_v16 = vpop.f32.mrf.mxu1 }
 0x11f   :  { %v1462_v11 = vpop.f32.mrf.mxu1 }
 0x150   :  { %v1413_v6 = vpop.f32.mrf.mxu0 }
 0x151   :  { %v1414_v17 = vadd.f32 %v1413_v6, %v1371_v9 }
 0x152   :  { %v1415_v12 = vpop.f32.mrf.mxu0 }
 0x153   :  { %v1416_v15 = vadd.f32 %v1415_v12, %v1373_v7  ;;  %v1457_v24 = vadd.f32 %v1456_v62, %v1414_v17 }
 0x154   :  { %v1417_v18 = vpop.f32.mrf.mxu0 }
 0x155   :  { %v1418_v20 = vadd.f32 %v1417_v18, %v1375_v13  ;;  %v1459_v22 = vadd.f32 %v1458_v3, %v1416_v15  ;;  %v1637_v27 = vmax.f32 %v1457_v24, 0.0  ;;  %v2806_v18 = vmov 0.0  }
 0x156   :  { %v1419_v21 = vpop.f32.mrf.mxu0  ;;  %2061 = vrot.lane.b32.xlu1 %v2806_v18, %s2807_s12 }
 0x157   :  { %v1461_v23 = vadd.f32 %v1460_v16, %v1418_v20  ;;  %v1420_v5 = vadd.f32 %v1419_v21, %v1377_v19  ;;  %v1638_v25 = vmax.f32 %v1459_v22, 0.0  ;;  %v2315_v16 = vld [vmem:[%s3042_s4] ss:$0 sm:$0xff] }
 0x159   :  { %v1463_v14 = vadd.f32 %v1462_v11, %v1420_v5  ;;  %v1641_v10 = vmax.f32 %v1461_v23, 0.0  ;;  %v1499_v30 = vpop.f32.mrf.mxu1 }
 0x15a   :  { %v1500_v41 = vadd.f32 %v1499_v30, %v265_v37 }
 0x15b   :  { %v1642_v26 = vmax.f32 %v1463_v14, 0.0  ;;  %v1645_v29 = vpack.c.bf16 %v1641_v10, %v1637_v27  ;;  %v1501_v51 = vpop.f32.mrf.mxu1 }
 0x15c   :  { %v1502_v40 = vadd.f32 %v1501_v51, %v269_v36 }
 0x15d   :  { %v1646_v28 = vpack.c.bf16 %v1642_v26, %v1638_v25  ;;  %v1503_v35 = vpop.f32.mrf.mxu1 }
 0x15e   :  { %v1504_v44 = vadd.f32 %v1503_v35, %v265_v37 }
 0x15f   :  { %1944 = vmatprep.mubr.bf16.mxu0 %v1646_v28  ;;  %v1505_v39 = vpop.f32.mrf.mxu1  ;;  %v1998_v28 = vld [vmem:[%s3043_s5] sm:$0xff] }
 0x160   :  { %1945 = vmatmul.mubr.bf16.vlgmr.msra.gmra.mxu0 %v1645_v29  ;;  %v1506_v49 = vadd.f32 %v1505_v39, %v269_v36  ;;  %v1999_v29 = vld [vmem:[%s3043_s5 + $0x8] sm:$0xff]  ;;  %s2809_s5 = smov [#allocation6]  }
 0x161   :  { %s2085_s17 = sshll.u32 %s2809_s5, 4  ;;  %s2086_s17 = int_to_ptr.vmem [resolvable:$true] %s2085_s17 }
 0x162   :  { %s2768_s18 = scalar_lea.vmem %s2086_s17, 256  ;;  %p2773_p6 = scmp.lt.s32.totalorder %s2086_s17, %s2086_s17 }
 0x163   :  { %p2769_p5 = scmp.ne.s32.totalorder %s2086_s17, %s2768_s18  ;;  %p2774_p7 = scmp.lt.s32.totalorder %s2768_s18, %s2768_s18 }
 0x165   :  { %p2775_p8 = por %p2774_p7, %p2773_p6 }
 0x167   :  { %p2776_p9 = pnand %p2775_p8, %p2769_p5 }
 0x190   :  { %v1542_v34 = vpop.f32.mrf.mxu0 }
 0x191   :  { %v1543_v46 = vadd.f32 %v1542_v34, %v1500_v41 }
 0x192   :  { %v1544_v4 = vpop.f32.mrf.mxu0 }
 0x193   :  { %v1545_v45 = vadd.f32 %v1544_v4, %v1502_v40 }
 0x194   :  { %v1546_v38 = vpop.f32.mrf.mxu0 }
 0x195   :  { %v1547_v52 = vadd.f32 %v1546_v38, %v1504_v44 }
 0x196   :  { %v1548_v33 = vpop.f32.mrf.mxu0 }
 0x197   :  { %v1549_v58 = vadd.f32 %v1548_v33, %v1506_v49 }
 0x198   :  { %v1628_v43 = vpop.f32.mrf.mxu0 }
 0x199   :  { %v1585_v42 = vpop.f32.mrf.mxu1 }
 0x19a   :  { %v1630_v48 = vpop.f32.mrf.mxu0  ;;  %v1586_v54 = vadd.f32 %v1585_v42, %v1543_v46 }
 0x19b   :  { %v1587_v47 = vpop.f32.mrf.mxu1 }
 0x19c   :  { %v1588_v53 = vadd.f32 %v1587_v47, %v1545_v45  ;;  %v1632_v56 = vpop.f32.mrf.mxu0  ;;  %v1629_v0 = vadd.f32 %v1628_v43, %v1586_v54 }
 0x19d   :  { %v1589_v55 = vpop.f32.mrf.mxu1 }
 0x19e   :  { %v1590_v57 = vadd.f32 %v1589_v55, %v1547_v52  ;;  %v1634_v60 = vpop.f32.mrf.mxu0  ;;  %v1631_v61 = vadd.f32 %v1630_v48, %v1588_v53  ;;  %v1639_v7 = vmax.f32 %v1629_v0, 0.0 }
 0x19f   :  { %v1591_v59 = vpop.f32.mrf.mxu1 }
 0x1a0   :  { %v1633_v62 = vadd.f32 %v1632_v56, %v1590_v57  ;;  %v1592_v63 = vadd.f32 %v1591_v59, %v1549_v58  ;;  %v1640_v3 = vmax.f32 %v1631_v61, 0.0 }
 0x1a2   :  { %v1635_v1 = vadd.f32 %v1634_v60, %v1592_v63  ;;  %v1643_v2 = vmax.f32 %v1633_v62, 0.0 }
 0x1a4   :  { %v1644_v6 = vmax.f32 %v1635_v1, 0.0  ;;  %v1647_v9 = vpack.c.bf16 %v1643_v2, %v1639_v7 }
 0x1a6   :  { %v1648_v8 = vpack.c.bf16 %v1644_v6, %v1640_v3 }
 0x1a8   :  { %1985 = vmatprep.mubr.bf16.mxu1 %v1648_v8 }
 0x1a9   :  { %1986 = vmatmul.mubr.bf16.vlgmr.msra.gmra.mxu1 %v1647_v9 }
 0x1c8   :  { %v2062_v37 = vpop.permute.xlu1 %2061 }
 0x1c9   :  { %v2066_v38 = vsel %vm2020_vm2, %v2062_v37, 0.0 }
 0x220   :  { %v2366_v12 = vpop.f32.mrf.mxu0 }
 0x222   :  { %v2367_v13 = vpop.f32.mrf.mxu0 }
 0x223   :  { %v2368_v15 = vadd.f32 %v2367_v13, %v2366_v12 }
 0x224   :  { %v2369_v30 = vpop.f32.mrf.mxu0 }
 0x225   :  { %v1947_v20 = vadd.f32 %v2368_v15, %v2315_v16 }
 0x226   :  { %v2370_v31 = vpop.f32.mrf.mxu0 }
 0x227   :  { %v2371_v34 = vadd.f32 %v2370_v31, %v2369_v30 }
 0x229   :  { %v1950_v35 = vadd.f32 %v2371_v34, %v2315_v16 }
 0x269   :  { %v2388_v17 = vpop.f32.mrf.mxu1 }
 0x26b   :  { %v2389_v19 = vpop.f32.mrf.mxu1 }
 0x26c   :  { %v2390_v21 = vadd.f32 %v2389_v19, %v2388_v17 }
 0x26d   :  { %v2391_v51 = vpop.f32.mrf.mxu1 }
 0x26e   :  { %v1988_v22 = vadd.f32 %v2390_v21, %v1947_v20 }
 0x26f   :  { %v2392_v32 = vpop.f32.mrf.mxu1 }
 0x270   :  { %v2034_v23 = vmul.f32 %v1988_v22, %v1988_v22  ;;  %v1994_v5 = vmul.f32 1.442695, %v1988_v22  ;;  %v2393_v50 = vadd.f32 %v2392_v32, %v2391_v51 }
 0x272   :  { %2038 = vrot.lane.b32.xlu0 %v2034_v23, %s2808_s13  ;;  %2744 = vpow2.f32 %v1994_v5  ;;  %v1991_v4 = vadd.f32 %v2393_v50, %v1950_v35 }
 0x274   :  { %v1996_v36 = vmul.f32 1.442695, %v1991_v4 }
 0x276   :  { %2746 = vpow2.f32 %v1996_v36 }
 0x27f   :  { %v2745_v11 = vpop.eup %2744 }
 0x280   :  { %v2032_v24 = vmul.f32 %v2745_v11, %v2745_v11 }
 0x283   :  { %v2747_v43 = vpop.eup %2746 }
 0x2e4   :  { %v2039_v14 = vpop.permute.xlu0 %2038 }
 0x2e5   :  { %v2044_v10 = vadd.f32 %v2039_v14, %v2032_v24 }
 0x2e7   :  { %v2046_v25 = vsub.f32 %v2044_v10, %v1988_v22 }
 0x2e9   :  { %v2348_v26 = vadd.f32 -0.5, %v2046_v25 }
 0x2eb   :  { %v2055_v27 = vsel %vm2030_vm1, %v2348_v26, 0.0 }
 0x2ec   :  { %2059 = vrot.lane.b32.xlu0 %v2055_v27, %s2807_s12 }
 0x2f0   :  { %2002 = vrot.lane.b32.xlu0 %v1998_v28, %s2808_s13 }
 0x2f4   :  { %2004 = vrot.lane.b32.xlu0 %v1999_v29, %s2808_s13 }
 0x35e   :  { %v2060_v39 = vpop.permute.xlu0 %2059 }
 0x35f   :  { %v2065_v33 = vsel %vm2020_vm2, %v2060_v39, 0.0 }
 0x360   :  { %v2067_v40 = vadd.f32 %v2066_v38, %v2065_v33 }
 0x362   :  { %2068 = vadd.xlane.f32.xlu1 %v2067_v40  ;;  %v2003_v41 = vpop.permute.xlu0 %2002 }
 0x363   :  { %v2008_v42 = vmul.f32 %v2745_v11, %v2003_v41 }
 0x365   :  { %2012 = vrot.lane.b32.xlu0 %v2008_v42, %s2807_s12 }
 0x366   :  { %v2005_v44 = vpop.permute.xlu0 %2004 }
 0x367   :  { %v2009_v45 = vmul.f32 %v2747_v43, %v2005_v44 }
 0x369   :  { %2014 = vrot.lane.b32.xlu0 %v2009_v45, %s2807_s12 }
 0x3d7   :  { %v2013_v46 = vpop.permute.xlu0 %2012 }
 0x3d8   :  { %v2018_v47 = vadd.f32 %v2013_v46, %v1988_v22 }
 0x3da   :  { %2021 = vst.msk [vmem:[#allocation6] sm:$0xff] %vm2020_vm2, %v2018_v47 }
 0x3db   :  { %v2015_v48 = vpop.permute.xlu0 %2014 }
 0x3dc   :  { %v2019_v49 = vadd.f32 %v2015_v48, %v1991_v4 }
 0x3de   :  { %2022 = vst.msk [vmem:[#allocation6 + $0x8] sm:$0xff] %vm2020_vm2, %v2019_v49 }
 0x3df   :  { %2779 = shalt.err (!%p2776_p9)
}
 0x3e0   :  { %s2810_s19 = smov 128   ;;  %s2811_s20 = smov 8  }
 0x3e1   :  { %2091 = dma.vmem_to_hbm [thread:$0]  %s2086_s17, 256, %s3044_s6, [#allocation4], %s2810_s19, %s2810_s19, %s2811_s20  }
 0x3e2   :  { %s2812_s23 = smov [#allocation7]  }
 0x3eb   :  { %v2069_v52 = vpop.xlane.xlu1 %2068 }
 0x3ec   :  { %v2070_v53 = vrot.slane %v2069_v52, 4 }
 0x3ee   :  { %v2071_v54 = vadd.f32 %v2070_v53, %v2069_v52 }
 0x3f0   :  { %v2072_v55 = vrot.slane %v2071_v54, 2 }
 0x3f2   :  { %v2073_v56 = vadd.f32 %v2072_v55, %v2071_v54 }
 0x3f4   :  { %v2074_v58 = vrot.slane %v2073_v56, 1 }
 0x3f6   :  { %v2075_v57 = vadd.f32 %v2074_v58, %v2073_v56 }
 0x3f8   :  { %2394 = vpush %v2075_v57 }
 0x429   :  { %s2395_s22 = spop %2394 }
 0x42a   :  { %2079 = sst [smem:[#allocation7]] %s2395_s22 }
 0x42b   :  { %2099 = dma.smem_to_hbm %s2812_s23, 16, %s3045_s7, [#allocation5]  }
 0x42c   :  { %2798 = dma.done.wait [#allocation4], 256  }
 0x42d   :  { %2799 = vsyncadd [#allocation4], 4294967040 }
 0x42e   :  { %2800 = dma.done.wait [#allocation5], 16  }
 0x42f   :  { %2801 = vsyncadd [#allocation5], 4294967280 }
 0x430   :  { %2106 = sfence }
 0x431   :  { %2107 = vsyncpa [#allocation3], 1 }
 0x432   :  { %2108 = vsyncpa [#allocation4], 1 }
 0x433   :  { %2109 = vsyncpa [#allocation5], 1 }

</bundles_post_ra>
